<compile_context>
chip_gen: v5e
topology: v5e:2x2
jax: 0.10.0
libtpu: 0.0.40
codegen_flags: <defaults>
</compile_context>

<pallas_src>
import math

import jax
import jax.numpy as jnp
from jax.experimental import pallas as pl
from jax.experimental.pallas import tpu as pltpu

HIDDEN = 128
MAX_TILE_B = 2048  # cap on lanes per grid step; real constraint is (8,128) tiling


def policy_kernel(x_ref, w1_ref, b1_ref, w2_ref, b2_ref, w3_ref, b3_ref, o_ref):
    # Feature-major: x_ref is (state_dim, tile_b); batch lives on the lane axis.
    x = x_ref[...].astype(jnp.bfloat16)

    # Layer 1: (hidden, state_dim) @ (state_dim, tile_b) -> (hidden, tile_b)
    h1 = jnp.dot(w1_ref[...], x, preferred_element_type=jnp.float32)
    h1 = jnp.maximum(h1 + b1_ref[...], 0.0).astype(jnp.bfloat16)

    # Layer 2: (hidden, hidden) @ (hidden, tile_b)
    h2 = jnp.dot(w2_ref[...], h1, preferred_element_type=jnp.float32)
    h2 = jnp.maximum(h2 + b2_ref[...], 0.0).astype(jnp.bfloat16)

    # Layer 3: (action_dim, hidden) @ (hidden, tile_b)
    logits = jnp.dot(w3_ref[...], h2, preferred_element_type=jnp.float32) + b3_ref[...]

    # Numerically-stable, per-lane (per-example) softmax over the action_dim
    # sublane rows. Exact divide so rows sum to 1 within f32 eps.
    m = jnp.max(logits, axis=0, keepdims=True)
    e = jnp.exp(logits - m)
    denom = jnp.sum(e, axis=0, keepdims=True)
    o_ref[...] = (e / denom).astype(o_ref.dtype)


def _pick_tile(batch, max_tile=MAX_TILE_B):
    """Lanes per grid step. <=256 rows: single full-batch step (block == full dim,
    no 128-divisibility needed). Otherwise aim for ~2 steps (keeps both v7x TCs
    fed via the 'parallel' axis), rounded to a multiple of 128, capped."""
    if batch <= 256:
        return batch
    half = -(-batch // 2)  # ceil(batch / 2)
    return min(max_tile, ((half + 127) // 128) * 128)


def policy_forward(x, params):
    """x: (batch, state_dim) f32. Returns (batch, action_dim) f32 probabilities."""
    w1, b1, w2, b2, w3, b3 = params  # PyTorch-native (out, in) weights, (out, 1) biases
    batch, state_dim = x.shape
    action_dim = w3.shape[0]

    tile_b = _pick_tile(batch)
    grid = pl.cdiv(batch, tile_b)

    # Layout plumbing only: present a feature-major (lane-dense) slab to the
    # kernel. For best results produce x feature-major / bf16 at the source.
    xt = x.T  # (state_dim, batch)

    const2d = lambda i: (0, 0)  # weights/biases: same block every step -> VMEM resident

    out = pl.pallas_call(
        policy_kernel,
        out_shape=jax.ShapeDtypeStruct((action_dim, batch), jnp.float32),
        grid=(grid,),
        in_specs=[
            pl.BlockSpec((state_dim, tile_b), lambda i: (0, i)),  # x tile (pipelined)
            pl.BlockSpec(w1.shape, const2d),
            pl.BlockSpec(b1.shape, const2d),
            pl.BlockSpec(w2.shape, const2d),
            pl.BlockSpec(b2.shape, const2d),
            pl.BlockSpec(w3.shape, const2d),
            pl.BlockSpec(b3.shape, const2d),
        ],
        out_specs=pl.BlockSpec((action_dim, tile_b), lambda i: (0, i)),
        compiler_params=pltpu.CompilerParams(
            dimension_semantics=("parallel",),  # shard batch steps across TCs on v7x
        ),
    )(xt, w1, b1, w2, b2, w3, b3)

    return out.T  # (batch, action_dim)


def init_params(key, state_dim, action_dim, hidden=HIDDEN):
    """PyTorch-style init U(-1/sqrt(fan_in), 1/sqrt(fan_in)); weights bf16,
    PyTorch-native (out_features, in_features) layout; biases f32 (out, 1)."""
    keys = jax.random.split(key, 6)

    def linear(kw, kb, fan_in, fan_out):
        bound = 1.0 / math.sqrt(fan_in)
        w = jax.random.uniform(kw, (fan_out, fan_in), jnp.float32, -bound, bound)
        b = jax.random.uniform(kb, (fan_out, 1), jnp.float32, -bound, bound)
        return w.astype(jnp.bfloat16), b

    w1, b1 = linear(keys[0], keys[1], state_dim, hidden)
    w2, b2 = linear(keys[2], keys[3], hidden, hidden)
    w3, b3 = linear(keys[4], keys[5], hidden, action_dim)
    return w1, b1, w2, b2, w3, b3


def reference_forward(x, params):
    """Pure-JAX reference mirroring the kernel's dtype choices (bf16 / f32 acc)."""
    w1, b1, w2, b2, w3, b3 = params
    h1 = jnp.dot(x.astype(jnp.bfloat16), w1.T, preferred_element_type=jnp.float32) + b1[:, 0]
    h1 = jnp.maximum(h1, 0.0).astype(jnp.bfloat16)
    h2 = jnp.dot(h1, w2.T, preferred_element_type=jnp.float32) + b2[:, 0]
    h2 = jnp.maximum(h2, 0.0).astype(jnp.bfloat16)
    logits = jnp.dot(h2, w3.T, preferred_element_type=jnp.float32) + b3[:, 0]
    return jax.nn.softmax(logits, axis=-1)


if __name__ == "__main__":
    # CartPole-style policy shapes: state_dim=4, action_dim=2.
    state_dim, action_dim = 4, 2

    key = jax.random.PRNGKey(0)
    k_params, k_small, k_big = jax.random.split(key, 3)
    params = init_params(k_params, state_dim, action_dim)

    # Two cases: tiny batch (single full-dim step) and a ragged multi-step grid.
    for batch, kx in ((8, k_small), (300, k_big)):
        x = jax.random.normal(kx, (batch, state_dim), dtype=jnp.float32)
        probs = policy_forward(x, params)
        jax.block_until_ready(probs)

        assert probs.shape == (batch, action_dim)
        row_sums = jnp.sum(probs, axis=-1)
        assert bool(jnp.all(jnp.abs(row_sums - 1.0) < 1e-5)), "row sums off"

        ref = reference_forward(x, params)
        assert bool(jnp.max(jnp.abs(probs - ref)) < 5e-3), "mismatch vs reference"

    print("KERNEL_OK")
</pallas_src>

<mosaic_0001>
module attributes {stable_mosaic.version = 11 : i64} {
  func.func @policy_kernel(%arg0: i32, %arg1: memref<4x8xf32, #tpu.memory_space<vmem>>, %arg2: memref<128x4xbf16, #tpu.memory_space<vmem>>, %arg3: memref<128x1xf32, #tpu.memory_space<vmem>>, %arg4: memref<128x128xbf16, #tpu.memory_space<vmem>>, %arg5: memref<128x1xf32, #tpu.memory_space<vmem>>, %arg6: memref<2x128xbf16, #tpu.memory_space<vmem>>, %arg7: memref<2x1xf32, #tpu.memory_space<vmem>>, %arg8: memref<2x8xf32, #tpu.memory_space<vmem>>) attributes {dimension_semantics = [#tpu.dimension_semantics<parallel>], iteration_bounds = array<i64: 1>, scalar_prefetch = 0 : i64, scratch_operands = 0 : i64, tpu.core_type = #tpu.core_type<tc>, window_params = [{transform_indices = @transform_0, window_bounds = array<i64: 4, 8>}, {pipeline_mode = #tpu.pipeline_mode<synchronous>, transform_indices = @transform_1, window_bounds = array<i64: 128, 4>}, {pipeline_mode = #tpu.pipeline_mode<synchronous>, transform_indices = @transform_2, window_bounds = array<i64: 128, 1>}, {pipeline_mode = #tpu.pipeline_mode<synchronous>, transform_indices = @transform_3, window_bounds = array<i64: 128, 128>}, {pipeline_mode = #tpu.pipeline_mode<synchronous>, transform_indices = @transform_4, window_bounds = array<i64: 128, 1>}, {pipeline_mode = #tpu.pipeline_mode<synchronous>, transform_indices = @transform_5, window_bounds = array<i64: 2, 128>}, {pipeline_mode = #tpu.pipeline_mode<synchronous>, transform_indices = @transform_6, window_bounds = array<i64: 2, 1>}, {transform_indices = @transform_7, window_bounds = array<i64: 2, 8>}]} {
    %c0 = arith.constant 0 : index
    %c0_0 = arith.constant 0 : index
    %0 = vector.load %arg1[%c0, %c0_0] : memref<4x8xf32, #tpu.memory_space<vmem>>, vector<4x8xf32>
    %1 = arith.truncf %0 : vector<4x8xf32> to vector<4x8xbf16>
    %c0_1 = arith.constant 0 : index
    %c0_2 = arith.constant 0 : index
    %2 = vector.load %arg2[%c0_1, %c0_2] : memref<128x4xbf16, #tpu.memory_space<vmem>>, vector<128x4xbf16>
    %cst = arith.constant dense<0.000000e+00> : vector<128x8xf32>
    %3 = tpu.matmul %2, %1, %cst {dimension_numbers = #tpu.dot_dimension_numbers<[1], [0], [0], [1], [0, 0, 1, 1], [], []>} : vector<128x4xbf16>, vector<4x8xbf16>, vector<128x8xf32> -> vector<128x8xf32>
    %c0_3 = arith.constant 0 : index
    %c0_4 = arith.constant 0 : index
    %4 = vector.load %arg3[%c0_3, %c0_4] : memref<128x1xf32, #tpu.memory_space<vmem>>, vector<128x1xf32>
    %5 = vector.broadcast %4 : vector<128x1xf32> to vector<128x8xf32>
    %6 = arith.addf %3, %5 : vector<128x8xf32>
    %cst_5 = arith.constant 0.000000e+00 : f32
    %7 = vector.broadcast %cst_5 : f32 to vector<128x8xf32>
    %8 = arith.maximumf %6, %7 : vector<128x8xf32>
    %9 = arith.truncf %8 : vector<128x8xf32> to vector<128x8xbf16>
    %c0_6 = arith.constant 0 : index
    %c0_7 = arith.constant 0 : index
    %10 = vector.load %arg4[%c0_6, %c0_7] : memref<128x128xbf16, #tpu.memory_space<vmem>>, vector<128x128xbf16>
    %cst_8 = arith.constant dense<0.000000e+00> : vector<128x8xf32>
    %11 = tpu.matmul %10, %9, %cst_8 {dimension_numbers = #tpu.dot_dimension_numbers<[1], [0], [0], [1], [0, 0, 1, 1], [], []>} : vector<128x128xbf16>, vector<128x8xbf16>, vector<128x8xf32> -> vector<128x8xf32>
    %c0_9 = arith.constant 0 : index
    %c0_10 = arith.constant 0 : index
    %12 = vector.load %arg5[%c0_9, %c0_10] : memref<128x1xf32, #tpu.memory_space<vmem>>, vector<128x1xf32>
    %13 = vector.broadcast %12 : vector<128x1xf32> to vector<128x8xf32>
    %14 = arith.addf %11, %13 : vector<128x8xf32>
    %cst_11 = arith.constant 0.000000e+00 : f32
    %15 = vector.broadcast %cst_11 : f32 to vector<128x8xf32>
    %16 = arith.maximumf %14, %15 : vector<128x8xf32>
    %17 = arith.truncf %16 : vector<128x8xf32> to vector<128x8xbf16>
    %c0_12 = arith.constant 0 : index
    %c0_13 = arith.constant 0 : index
    %18 = vector.load %arg6[%c0_12, %c0_13] : memref<2x128xbf16, #tpu.memory_space<vmem>>, vector<2x128xbf16>
    %cst_14 = arith.constant dense<0.000000e+00> : vector<2x8xf32>
    %19 = tpu.matmul %18, %17, %cst_14 {dimension_numbers = #tpu.dot_dimension_numbers<[1], [0], [0], [1], [0, 0, 1, 1], [], []>} : vector<2x128xbf16>, vector<128x8xbf16>, vector<2x8xf32> -> vector<2x8xf32>
    %c0_15 = arith.constant 0 : index
    %c0_16 = arith.constant 0 : index
    %20 = vector.load %arg7[%c0_15, %c0_16] : memref<2x1xf32, #tpu.memory_space<vmem>>, vector<2x1xf32>
    %21 = vector.broadcast %20 : vector<2x1xf32> to vector<2x8xf32>
    %22 = arith.addf %19, %21 : vector<2x8xf32>
    %cst_17 = arith.constant dense<0xFF800000> : vector<8xf32>
    %23 = vector.multi_reduction <maximumf>, %22, %cst_17 [0] : vector<2x8xf32> to vector<8xf32>
    %24 = vector.shape_cast %23 : vector<8xf32> to vector<1x8xf32>
    %25 = vector.broadcast %24 : vector<1x8xf32> to vector<2x8xf32>
    %26 = arith.subf %22, %25 : vector<2x8xf32>
    %27 = math.exp %26 : vector<2x8xf32>
    %cst_18 = arith.constant dense<0.000000e+00> : vector<8xf32>
    %28 = vector.multi_reduction <add>, %27, %cst_18 [0] : vector<2x8xf32> to vector<8xf32>
    %29 = vector.shape_cast %28 : vector<8xf32> to vector<1x8xf32>
    %30 = vector.broadcast %29 : vector<1x8xf32> to vector<2x8xf32>
    %31 = arith.divf %27, %30 : vector<2x8xf32>
    %c0_19 = arith.constant 0 : index
    %c0_20 = arith.constant 0 : index
    %32 = vector.load %arg8[%c0_19, %c0_20] : memref<2x8xf32, #tpu.memory_space<vmem>>, vector<2x8xf32>
    tpu.vector_store %arg8[%c0_19, %c0_20], %31 {strides = array<i32>} : memref<2x8xf32, #tpu.memory_space<vmem>>, vector<2x8xf32>,
    return
  }
  func.func @transform_0(%arg0: i32) -> (i32, i32) {
    %c0_i32 = arith.constant 0 : i32
    %c0_i32_0 = arith.constant 0 : i32
    return %c0_i32, %arg0 : i32, i32
  }
  func.func @transform_1(%arg0: i32) -> (i32, i32) {
    %c0_i32 = arith.constant 0 : i32
    %c0_i32_0 = arith.constant 0 : i32
    %c0_i32_1 = arith.constant 0 : i32
    return %c0_i32, %c0_i32_0 : i32, i32
  }
  func.func @transform_2(%arg0: i32) -> (i32, i32) {
    %c0_i32 = arith.constant 0 : i32
    %c0_i32_0 = arith.constant 0 : i32
    %c0_i32_1 = arith.constant 0 : i32
    return %c0_i32, %c0_i32_0 : i32, i32
  }
  func.func @transform_3(%arg0: i32) -> (i32, i32) {
    %c0_i32 = arith.constant 0 : i32
    %c0_i32_0 = arith.constant 0 : i32
    %c0_i32_1 = arith.constant 0 : i32
    return %c0_i32, %c0_i32_0 : i32, i32
  }
  func.func @transform_4(%arg0: i32) -> (i32, i32) {
    %c0_i32 = arith.constant 0 : i32
    %c0_i32_0 = arith.constant 0 : i32
    %c0_i32_1 = arith.constant 0 : i32
    return %c0_i32, %c0_i32_0 : i32, i32
  }
  func.func @transform_5(%arg0: i32) -> (i32, i32) {
    %c0_i32 = arith.constant 0 : i32
    %c0_i32_0 = arith.constant 0 : i32
    %c0_i32_1 = arith.constant 0 : i32
    return %c0_i32, %c0_i32_0 : i32, i32
  }
  func.func @transform_6(%arg0: i32) -> (i32, i32) {
    %c0_i32 = arith.constant 0 : i32
    %c0_i32_0 = arith.constant 0 : i32
    %c0_i32_1 = arith.constant 0 : i32
    return %c0_i32, %c0_i32_0 : i32, i32
  }
  func.func @transform_7(%arg0: i32) -> (i32, i32) {
    %c0_i32 = arith.constant 0 : i32
    %c0_i32_0 = arith.constant 0 : i32
    return %c0_i32, %arg0 : i32, i32
  }
}

</mosaic_0001>

<bundles_post_ra>
// kernel: tpu_custom_call.1
= control target key start
LH: loop header
LB: loop body
LE: loop exit
PB: predicated region body
PF: predicated region fallthrough
CT: control target
= control target key end

     0   :  { %vm207_vm0 = vcmask 1041408   ;;  %v719_v2 = vmov 0   ;;  %vm182_vm1 = vcmask 31744   ;;  %s934_s0 = inlined_call_operand.vmem [shape: f32[4,8], index: 0, kind: input, shape index: {}]   ;;  %s935_s1 = inlined_call_operand.vmem [shape: bf16[128,4], index: 1, kind: input, shape index: {}]   ;;  %s936_s2 = inlined_call_operand.vmem [shape: f32[128,1], index: 2, kind: input, shape index: {}]   ;;  %s937_s3 = inlined_call_operand.vmem [shape: bf16[128,128], index: 3, kind: input, shape index: {}]   ;;  %s938_s4 = inlined_call_operand.vmem [shape: f32[128,1], index: 4, kind: input, shape index: {}]   ;;  %s939_s5 = inlined_call_operand.vmem [shape: bf16[2,128], index: 5, kind: input, shape index: {}]   ;;  %s940_s6 = inlined_call_operand.vmem [shape: f32[2,1], index: 6, kind: input, shape index: {}]   ;;  %s941_s7 = inlined_call_operand.hbm [shape: f32[2,8], index: 7, kind: output, shape index: {}]  }
   0x1   :  { %v60_v0 = vld [vmem:[%s936_s2 + $0x70] sm:$0xff]  ;;  %v28_v1 = vld [vmem:[%s934_s0] sm:$0xf]  ;;  %686 = vset.pattern.permute.xlu0 %v719_v2  ;;  %688 = vset.pattern.permute.xlu2 %v719_v2 }
   0x2   :  { %v29_v3 = vpack.c.bf16 %v28_v1, %v28_v1  ;;  %v58_v4 = vld [vmem:[%s936_s2 + $0x60] sm:$0xff]  ;;  %v56_v5 = vld [vmem:[%s936_s2 + $0x50] sm:$0xff]  ;;  %134 = vperm.xlu0 %686, %v60_v0   ;;  %687 = vset.pattern.permute.xlu1 %v719_v2 }
   0x3   :  { %v659_v7 = vld [vmem:[%s935_s1] sm:$0xff]  ;;  %124 = vperm.xlu1 %687, %v58_v4   ;;  %114 = vperm.xlu2 %688, %v56_v5   ;;  %v665_v8 = vld [vmem:[%s935_s1 + $0x30] sm:$0xff] }
   0x4   :  { %v209_v6 = vsel %vm207_vm0, %v29_v3, 0 }
   0x5   :  { %218 = vmatpush.bf16.msra.mxu0 %v209_v6  ;;  %675 = vmatpush.bf16.msra.mxu2 %v209_v6 }
   0x6   :  { %12 = vsyncpa [#allocation3], 0  ;;  %v61_v9 = vld [vmem:[%s936_s2 + $0x78] sm:$0xff]  ;;  %v59_v10 = vld [vmem:[%s936_s2 + $0x68] sm:$0xff]  ;;  %vm537_vm2 = vcmask 58368   ;;  %s578_s27 = sshll.u32 %s941_s7, 4  ;;  %s579_s27 = int_to_ptr.hbm [resolvable:$true] %s578_s27 }
   0x7   :  { %v57_v11 = vld [vmem:[%s936_s2 + $0x58] sm:$0xff]  ;;  %v54_v12 = vld [vmem:[%s936_s2 + $0x40] sm:$0xff]  ;;  %v55_v13 = vld [vmem:[%s936_s2 + $0x48] sm:$0xff] }
   0x8   :  { %619 = vmatmul.msk.bf16.vlgmr.msra.gmra.mxu0 %vm182_vm1, %v659_v7  ;;  %625 = vmatmul.msk.bf16.vlgmr.msra.gmra.mxu2 %vm182_vm1, %v665_v8  ;;  %v52_v14 = vld [vmem:[%s936_s2 + $0x30] sm:$0xff]  ;;  %v660_v15 = vld [vmem:[%s935_s1 + $0x8] sm:$0xff]  ;;  %v666_v16 = vld [vmem:[%s935_s1 + $0x38] sm:$0xff] }
   0x9   :  { %v53_v17 = vld [vmem:[%s936_s2 + $0x38] sm:$0xff]  ;;  %v51_v18 = vld [vmem:[%s936_s2 + $0x28] sm:$0xff]  ;;  %v50_v19 = vld [vmem:[%s936_s2 + $0x20] sm:$0xff] }
   0xa   :  { %139 = vperm.xlu0 %686, %v61_v9   ;;  %v48_v20 = vld [vmem:[%s936_s2 + $0x10] sm:$0xff]  ;;  %v49_v21 = vld [vmem:[%s936_s2 + $0x18] sm:$0xff]  ;;  %v46_v22 = vld [vmem:[%s936_s2] sm:$0xff] }
   0xb   :  { %129 = vperm.xlu1 %687, %v59_v10   ;;  %119 = vperm.xlu2 %688, %v57_v11   ;;  %v661_v23 = vld [vmem:[%s935_s1 + $0x10] sm:$0xff]  ;;  %v47_v24 = vld [vmem:[%s936_s2 + $0x8] sm:$0xff]  ;;  %v315_v26 = vld [vmem:[%s938_s4 + $0x78] sm:$0xff] }
   0xc   :  { %v314_v25 = vld [vmem:[%s938_s4 + $0x70] sm:$0xff]  ;;  %v312_v27 = vld [vmem:[%s938_s4 + $0x60] sm:$0xff]  ;;  %v313_v28 = vld [vmem:[%s938_s4 + $0x68] sm:$0xff] }
   0xd   :  { %v310_v29 = vld [vmem:[%s938_s4 + $0x50] sm:$0xff]  ;;  %v662_v30 = vld [vmem:[%s935_s1 + $0x18] sm:$0xff]  ;;  %v308_v32 = vld [vmem:[%s938_s4 + $0x40] sm:$0xff] }
   0xe   :  { %v311_v31 = vld [vmem:[%s938_s4 + $0x58] sm:$0xff]  ;;  %v309_v33 = vld [vmem:[%s938_s4 + $0x48] sm:$0xff]  ;;  %v306_v34 = vld [vmem:[%s938_s4 + $0x30] sm:$0xff] }
   0xf   :  { %v307_v35 = vld [vmem:[%s938_s4 + $0x38] sm:$0xff]  ;;  %v304_v36 = vld [vmem:[%s938_s4 + $0x20] sm:$0xff]  ;;  %v305_v38 = vld [vmem:[%s938_s4 + $0x28] sm:$0xff] }
  0x10   :  { %v663_v37 = vld [vmem:[%s935_s1 + $0x20] sm:$0xff]  ;;  %v302_v39 = vld [vmem:[%s938_s4 + $0x10] sm:$0xff]  ;;  %v303_v40 = vld [vmem:[%s938_s4 + $0x18] sm:$0xff] }
  0x11   :  { %v300_v41 = vld [vmem:[%s938_s4] sm:$0xff]  ;;  %v301_v42 = vld [vmem:[%s938_s4 + $0x8] sm:$0xff] }
  0x12   :  { %104 = vperm.xlu0 %686, %v54_v12   ;;  %v664_v43 = vld [vmem:[%s935_s1 + $0x28] sm:$0xff]  ;;  %v518_v44 = vld [vmem:[%s940_s6] sm:$0x3] }
  0x13   :  { %109 = vperm.xlu1 %687, %v55_v13   ;;  %94 = vperm.xlu2 %688, %v52_v14  }
  0x18   :  { %620 = vmatmul.msk.bf16.gmra.mxu0 %vm182_vm1, %v660_v15  ;;  %626 = vmatmul.msk.bf16.gmra.mxu2 %vm182_vm1, %v666_v16 }
  0x1a   :  { %99 = vperm.xlu0 %686, %v53_v17  }
  0x1b   :  { %89 = vperm.xlu2 %688, %v51_v18   ;;  %84 = vperm.xlu1 %687, %v50_v19  }
  0x22   :  { %74 = vperm.xlu0 %686, %v48_v20  }
  0x23   :  { %79 = vperm.xlu1 %687, %v49_v21   ;;  %64 = vperm.xlu2 %688, %v46_v22  }
  0x28   :  { %621 = vmatmul.msk.bf16.gmra.mxu0 %vm182_vm1, %v661_v23 }
  0x2a   :  { %69 = vperm.xlu0 %686, %v47_v24  }
  0x2b   :  { %388 = vperm.xlu1 %687, %v314_v25   ;;  %393 = vperm.xlu2 %688, %v315_v26  }
  0x32   :  { %378 = vperm.xlu0 %686, %v312_v27  }
  0x33   :  { %383 = vperm.xlu1 %687, %v313_v28   ;;  %368 = vperm.xlu2 %688, %v310_v29  }
  0x38   :  { %622 = vmatmul.msk.bf16.gmra.mxu0 %vm182_vm1, %v662_v30 }
  0x3a   :  { %373 = vperm.xlu0 %686, %v311_v31  }
  0x3b   :  { %358 = vperm.xlu1 %687, %v308_v32   ;;  %363 = vperm.xlu2 %688, %v309_v33  }
  0x42   :  { %348 = vperm.xlu0 %686, %v306_v34  }
  0x43   :  { %353 = vperm.xlu1 %687, %v307_v35   ;;  %338 = vperm.xlu2 %688, %v304_v36  }
  0x48   :  { %623 = vmatmul.msk.bf16.gmra.mxu0 %vm182_vm1, %v663_v37 }
  0x4a   :  { %343 = vperm.xlu0 %686, %v305_v38  }
  0x4b   :  { %328 = vperm.xlu1 %687, %v302_v39   ;;  %333 = vperm.xlu2 %688, %v303_v40  }
  0x52   :  { %318 = vperm.xlu0 %686, %v300_v41  }
  0x53   :  { %323 = vperm.xlu1 %687, %v301_v42   ;;  %521 = vperm.xlu2 %688, %v518_v44  }
  0x58   :  { %624 = vmatmul.msk.bf16.gmra.mxu0 %vm182_vm1, %v664_v43 }
  0x5d   :  { %v115_v45 = vpop.permute.xlu2 %114 }
  0x65   :  { %v120_v48 = vpop.permute.xlu2 %119 }
  0x6d   :  { %v95_v51 = vpop.permute.xlu2 %94 }
  0x74   :  { %v135_v46 = vpop.permute.xlu0 %134 }
  0x75   :  { %v125_v47 = vpop.permute.xlu1 %124  ;;  %v90_v58 = vpop.permute.xlu2 %89 }
  0x7c   :  { %v140_v49 = vpop.permute.xlu0 %139 }
  0x7d   :  { %v130_v50 = vpop.permute.xlu1 %129  ;;  %v65_v63 = vpop.permute.xlu2 %64 }
  0x84   :  { %v105_v52 = vpop.permute.xlu0 %104 }
  0x85   :  { %v220_v53 = vpop.f32.mrf.mxu0  ;;  %v110_v54 = vpop.permute.xlu1 %109 }
  0x86   :  { %v221_v0 = vadd.f32 %v220_v53, %v65_v63 }
  0x88   :  { %v260_v8 = vmax.f32 %v221_v0, 0.0 }
  0x8b   :  { %v250_v55 = vpop.f32.mrf.mxu2 }
  0x8c   :  { %v100_v56 = vpop.permute.xlu0 %99  ;;  %v251_v13 = vadd.f32 %v250_v55, %v125_v47  ;;  %v668_v55 = vld [vmem:[%s937_s3 + $0x8] sm:$0xff] }
  0x8d   :  { %v222_v57 = vpop.f32.mrf.mxu0  ;;  %v85_v59 = vpop.permute.xlu1 %84 }
  0x8e   :  { %v272_v21 = vmax.f32 %v251_v13, 0.0 }
  0x93   :  { %v252_v60 = vpop.f32.mrf.mxu2 }
  0x94   :  { %v75_v61 = vpop.permute.xlu0 %74  ;;  %v253_v14 = vadd.f32 %v252_v60, %v130_v50  ;;  %v674_v60 = vld [vmem:[%s937_s3 + $0x38] sm:$0xff] }
  0x95   :  { %v225_v62 = vpop.f32.mrf.mxu0  ;;  %v80_v1 = vpop.permute.xlu1 %79 }
  0x96   :  { %v226_v3 = vadd.f32 %v225_v62, %v75_v61  ;;  %v273_v22 = vmax.f32 %v253_v14, 0.0 }
  0x98   :  { %v262_v9 = vmax.f32 %v226_v3, 0.0  ;;  %v282_v25 = vpack.c.bf16 %v273_v22, %v272_v21 }
  0x9b   :  { %v255_v2 = vpop.f32.mrf.mxu2 }
  0x9c   :  { %v70_v4 = vpop.permute.xlu0 %69  ;;  %v256_v12 = vadd.f32 %v255_v2, %v135_v46 }
  0x9d   :  { %v227_v5 = vpop.f32.mrf.mxu0  ;;  %v223_v6 = vadd.f32 %v222_v57, %v70_v4  ;;  %v669_v57 = vld [vmem:[%s937_s3 + $0x10] sm:$0xff] }
  0x9e   :  { %v228_v7 = vadd.f32 %v227_v5, %v80_v1  ;;  %v274_v18 = vmax.f32 %v256_v12, 0.0  ;;  %v389_v5 = vpop.permute.xlu1 %388 }
  0x9f   :  { %v261_v10 = vmax.f32 %v223_v6, 0.0 }
  0xa0   :  { %v263_v11 = vmax.f32 %v228_v7, 0.0  ;;  %v394_v7 = vpop.permute.xlu2 %393 }
  0xa1   :  { %v276_v16 = vpack.c.bf16 %v261_v10, %v260_v8 }
  0xa2   :  { %v277_v15 = vpack.c.bf16 %v263_v11, %v262_v9 }
  0xa3   :  { %v257_v17 = vpop.f32.mrf.mxu2 }
  0xa4   :  { %v258_v19 = vadd.f32 %v257_v17, %v140_v49  ;;  %v379_v11 = vpop.permute.xlu0 %378 }
  0xa5   :  { %v230_v20 = vpop.f32.mrf.mxu0 }
  0xa6   :  { %v275_v23 = vmax.f32 %v258_v19, 0.0  ;;  %v231_v49 = vadd.f32 %v230_v20, %v85_v59  ;;  %v670_v59 = vld [vmem:[%s937_s3 + $0x18] sm:$0xff]  ;;  %v384_v9 = vpop.permute.xlu1 %383 }
  0xa8   :  { %v283_v24 = vpack.c.bf16 %v275_v23, %v274_v18  ;;  %v369_v12 = vpop.permute.xlu2 %368 }
  0xaa   :  { %444 = vmatpush.bf16.msra.mxu1 %v283_v24  ;;  %676 = vmatpush.bf16.msra.mxu3 %v283_v24 }
  0xad   :  { %v232_v26 = vpop.f32.mrf.mxu0 }
  0xae   :  { %445 = vmatpush.bf16.msra.mxu1 %v282_v25  ;;  %677 = vmatpush.bf16.msra.mxu3 %v282_v25  ;;  %v233_v44 = vadd.f32 %v232_v26, %v90_v58  ;;  %v673_v58 = vld [vmem:[%s937_s3 + $0x30] sm:$0xff] }
  0xb0   :  { %v364_v17 = vpop.permute.xlu2 %363 }
  0xb5   :  { %v235_v27 = vpop.f32.mrf.mxu0 }
  0xb6   :  { %v236_v42 = vadd.f32 %v235_v27, %v95_v51  ;;  %v667_v51 = vld [vmem:[%s937_s3] sm:$0xff] }
  0xb8   :  { %v266_v50 = vmax.f32 %v236_v42, 0.0 }
  0xbd   :  { %v237_v28 = vpop.f32.mrf.mxu0 }
  0xbe   :  { %v238_v39 = vadd.f32 %v237_v28, %v100_v56  ;;  %v672_v56 = vld [vmem:[%s937_s3 + $0x28] sm:$0xff] }
  0xc0   :  { %v267_v46 = vmax.f32 %v238_v39, 0.0 }
  0xc2   :  { %v279_v53 = vpack.c.bf16 %v267_v46, %v266_v50 }
  0xc5   :  { %v240_v29 = vpop.f32.mrf.mxu0 }
  0xc6   :  { %v241_v36 = vadd.f32 %v240_v29, %v105_v52 }
  0xc8   :  { %v268_v43 = vmax.f32 %v241_v36, 0.0  ;;  %v339_v36 = vpop.permute.xlu2 %338 }
  0xcd   :  { %v242_v30 = vpop.f32.mrf.mxu0 }
  0xce   :  { %v243_v34 = vadd.f32 %v242_v30, %v110_v54  ;;  %v671_v54 = vld [vmem:[%s937_s3 + $0x20] sm:$0xff] }
  0xd0   :  { %v269_v40 = vmax.f32 %v243_v34, 0.0 }
  0xd2   :  { %v280_v47 = vpack.c.bf16 %v269_v40, %v268_v43 }
  0xd5   :  { %v245_v31 = vpop.f32.mrf.mxu0 }
  0xd6   :  { %v246_v32 = vadd.f32 %v245_v31, %v115_v45  ;;  %v265_v45 = vmax.f32 %v233_v44, 0.0 }
  0xd8   :  { %v270_v37 = vmax.f32 %v246_v32, 0.0 }
  0xdd   :  { %v247_v33 = vpop.f32.mrf.mxu0 }
  0xde   :  { %v248_v35 = vadd.f32 %v247_v33, %v120_v48  ;;  %v264_v48 = vmax.f32 %v231_v49, 0.0 }
  0xe0   :  { %v271_v38 = vmax.f32 %v248_v35, 0.0  ;;  %v278_v52 = vpack.c.bf16 %v265_v45, %v264_v48 }
  0xe2   :  { %v281_v41 = vpack.c.bf16 %v271_v38, %v270_v37 }
  0xe4   :  { %446 = vmatpush.bf16.msra.mxu1 %v281_v41  ;;  %678 = vmatpush.bf16.msra.mxu3 %v281_v41 }
  0xe8   :  { %447 = vmatpush.bf16.msra.mxu1 %v280_v47  ;;  %679 = vmatpush.bf16.msra.mxu3 %v280_v47 }
  0xec   :  { %448 = vmatpush.bf16.msra.mxu1 %v279_v53  ;;  %680 = vmatpush.bf16.msra.mxu3 %v279_v53 }
  0xf0   :  { %449 = vmatpush.bf16.msra.mxu1 %v278_v52  ;;  %681 = vmatpush.bf16.msra.mxu3 %v278_v52  ;;  %v334_v52 = vpop.permute.xlu2 %333 }
  0xf4   :  { %450 = vmatpush.bf16.msra.mxu1 %v277_v15  ;;  %682 = vmatpush.bf16.msra.mxu3 %v277_v15  ;;  %v359_v15 = vpop.permute.xlu1 %358 }
  0xf8   :  { %451 = vmatpush.bf16.msra.mxu1 %v276_v16  ;;  %683 = vmatpush.bf16.msra.mxu3 %v276_v16  ;;  %v374_v16 = vpop.permute.xlu0 %373 }
  0xfb   :  { %452 = vmatmul.bf16.vlgmr.msra.gmra.mxu1 %v667_v51  ;;  %472 = vmatmul.bf16.vlgmr.msra.gmra.mxu3 %v671_v54 }
  0xfc   :  { %v354_v26 = vpop.permute.xlu1 %353 }
 0x100   :  { %v349_v30 = vpop.permute.xlu0 %348 }
 0x104   :  { %v329_v43 = vpop.permute.xlu1 %328 }
 0x108   :  { %v344_v47 = vpop.permute.xlu0 %343 }
 0x10b   :  { %457 = vmatmul.bf16.gmra.mxu1 %v668_v55  ;;  %477 = vmatmul.bf16.gmra.mxu3 %v672_v56 }
 0x11b   :  { %462 = vmatmul.bf16.gmra.mxu1 %v669_v57  ;;  %482 = vmatmul.bf16.gmra.mxu3 %v673_v58  ;;  %v324_v58 = vpop.permute.xlu1 %323 }
 0x12b   :  { %467 = vmatmul.bf16.gmra.mxu1 %v670_v59  ;;  %487 = vmatmul.bf16.gmra.mxu3 %v674_v60 }
 0x178   :  { %v919_v61 = vpop.f32.mrf.mxu1 }
 0x17e   :  { %v473_v62 = vpop.f32.mrf.mxu3 }
 0x17f   :  { %v474_v38 = vadd.f32 %v473_v62, %v359_v15 }
 0x180   :  { %v921_v63 = vpop.f32.mrf.mxu1 }
 0x181   :  { %v501_v44 = vmax.f32 %v474_v38, 0.0  ;;  %v456_v59 = vadd.f32 %v921_v63, %v324_v58 }
 0x186   :  { %v475_v0 = vpop.f32.mrf.mxu3 }
 0x187   :  { %v476_v33 = vadd.f32 %v475_v0, %v364_v17  ;;  %v319_v0 = vpop.permute.xlu0 %318 }
 0x188   :  { %v458_v1 = vpop.f32.mrf.mxu1 }
 0x189   :  { %v502_v40 = vmax.f32 %v476_v33, 0.0  ;;  %v459_v56 = vadd.f32 %v458_v1, %v329_v43  ;;  %v517_v1 = vld [vmem:[%s939_s5] sm:$0x1]  ;;  %s720_s5 = smov [#allocation2]  }
 0x18a   :  { %s576_s24 = sshll.u32 %s720_s5, 4  ;;  %s577_s24 = int_to_ptr.vmem [resolvable:$true] %s576_s24 }
 0x18b   :  { %v513_v45 = vpack.c.bf16 %v502_v40, %v501_v44 }
 0x18e   :  { %v478_v2 = vpop.f32.mrf.mxu3 }
 0x18f   :  { %v479_v31 = vadd.f32 %v478_v2, %v369_v12  ;;  %v454_v2 = vadd.f32 %v919_v61, %v319_v0 }
 0x190   :  { %v460_v4 = vpop.f32.mrf.mxu1 }
 0x191   :  { %v503_v39 = vmax.f32 %v479_v31, 0.0  ;;  %v461_v51 = vadd.f32 %v460_v4, %v334_v52 }
 0x193   :  { %v496_v60 = vmax.f32 %v461_v51, 0.0 }
 0x196   :  { %v480_v3 = vpop.f32.mrf.mxu3 }
 0x197   :  { %v481_v27 = vadd.f32 %v480_v3, %v374_v16  ;;  %v495_v3 = vmax.f32 %v459_v56, 0.0 }
 0x198   :  { %v463_v8 = vpop.f32.mrf.mxu1 }
 0x199   :  { %v504_v34 = vmax.f32 %v481_v27, 0.0  ;;  %v464_v53 = vadd.f32 %v463_v8, %v339_v36  ;;  %v522_v8 = vpop.permute.xlu2 %521 }
 0x19b   :  { %v514_v42 = vpack.c.bf16 %v504_v34, %v503_v39  ;;  %v497_v57 = vmax.f32 %v464_v53, 0.0 }
 0x19e   :  { %v483_v6 = vpop.f32.mrf.mxu3 }
 0x19f   :  { %v484_v23 = vadd.f32 %v483_v6, %v379_v11  ;;  %v510_v6 = vpack.c.bf16 %v496_v60, %v495_v3 }
 0x1a0   :  { %v465_v13 = vpop.f32.mrf.mxu1 }
 0x1a1   :  { %v505_v32 = vmax.f32 %v484_v23, 0.0  ;;  %v466_v49 = vadd.f32 %v465_v13, %v344_v47 }
 0x1a3   :  { %v498_v54 = vmax.f32 %v466_v49, 0.0 }
 0x1a5   :  { %v511_v62 = vpack.c.bf16 %v498_v54, %v497_v57 }
 0x1a6   :  { %v485_v10 = vpop.f32.mrf.mxu3 }
 0x1a7   :  { %v486_v21 = vadd.f32 %v485_v10, %v384_v9 }
 0x1a8   :  { %v468_v19 = vpop.f32.mrf.mxu1 }
 0x1a9   :  { %v506_v28 = vmax.f32 %v486_v21, 0.0  ;;  %v469_v46 = vadd.f32 %v468_v19, %v349_v30 }
 0x1ab   :  { %v515_v35 = vpack.c.bf16 %v506_v28, %v505_v32  ;;  %v499_v48 = vmax.f32 %v469_v46, 0.0 }
 0x1ae   :  { %v488_v14 = vpop.f32.mrf.mxu3 }
 0x1af   :  { %v489_v18 = vadd.f32 %v488_v14, %v389_v5  ;;  %v494_v5 = vmax.f32 %v456_v59, 0.0 }
 0x1b0   :  { %v470_v37 = vpop.f32.mrf.mxu1 }
 0x1b1   :  { %v507_v24 = vmax.f32 %v489_v18, 0.0  ;;  %v471_v41 = vadd.f32 %v470_v37, %v354_v26 }
 0x1b3   :  { %v500_v50 = vmax.f32 %v471_v41, 0.0 }
 0x1b5   :  { %v512_v55 = vpack.c.bf16 %v500_v50, %v499_v48 }
 0x1b6   :  { %v490_v20 = vpop.f32.mrf.mxu3 }
 0x1b7   :  { %v491_v22 = vadd.f32 %v490_v20, %v394_v7  ;;  %v493_v7 = vmax.f32 %v454_v2, 0.0 }
 0x1b9   :  { %v508_v25 = vmax.f32 %v491_v22, 0.0  ;;  %v509_v4 = vpack.c.bf16 %v494_v5, %v493_v7 }
 0x1bb   :  { %v516_v29 = vpack.c.bf16 %v508_v25, %v507_v24 }
 0x1bd   :  { %524 = vmatpush.bf16.msrb.mxu2 %v516_v29 }
 0x1c1   :  { %525 = vmatpush.bf16.msrb.mxu2 %v515_v35 }
 0x1c5   :  { %526 = vmatpush.bf16.msrb.mxu2 %v514_v42 }
 0x1c9   :  { %527 = vmatpush.bf16.msrb.mxu2 %v513_v45 }
 0x1cd   :  { %528 = vmatpush.bf16.msrb.mxu2 %v512_v55 }
 0x1d1   :  { %529 = vmatpush.bf16.msrb.mxu2 %v511_v62 }
 0x1d5   :  { %530 = vmatpush.bf16.msrb.mxu2 %v510_v6 }
 0x1d9   :  { %531 = vmatpush.bf16.msrb.mxu2 %v509_v4 }
 0x1dc   :  { %532 = vmatmul.bf16.vlgmr.msrb.gmra.mxu2 %v517_v1 }
 0x25f   :  { %v533_v63 = vpop.f32.mrf.mxu2 }
 0x260   :  { %v534_v9 = vadd.f32 %v533_v63, %v522_v8 }
 0x262   :  { %v538_v10 = vsel %vm537_vm2, %v534_v9, -inf }
 0x263   :  { %v539_v61 = vrot.slane %v538_v10, 4 }
 0x265   :  { %v540_v11 = vmax.f32 %v538_v10, %v539_v61 }
 0x267   :  { %v541_v12 = vrot.slane %v540_v11, 2  ;;  %v535_v13 = vpop.f32.mrf.mxu2 }
 0x269   :  { %v542_v14 = vmax.f32 %v540_v11, %v541_v12 }
 0x26b   :  { %v543_v15 = vrot.slane %v542_v14, 1 }
 0x26d   :  { %v544_v16 = vmax.f32 %v542_v14, %v543_v15 }
 0x26f   :  { %v545_v17 = vsub.f32 %v534_v9, %v544_v16 }
 0x271   :  { %v546_v18 = vmul.f32 1.442695, %v545_v17 }
 0x273   :  { %689 = vpow2.f32 %v546_v18 }
 0x279   :  { %v690_v19 = vpop.eup %689 }
 0x27a   :  { %v548_v20 = vsel %vm537_vm2, %v690_v19, 0.0 }
 0x27b   :  { %v549_v21 = vrot.slane %v548_v20, 4 }
 0x27d   :  { %v550_v22 = vadd.f32 %v549_v21, %v548_v20 }
 0x27f   :  { %v551_v23 = vrot.slane %v550_v22, 2 }
 0x281   :  { %v552_v24 = vadd.f32 %v551_v23, %v550_v22 }
 0x283   :  { %v553_v25 = vrot.slane %v552_v24, 1 }
 0x285   :  { %v554_v26 = vadd.f32 %v553_v25, %v552_v24 }
 0x287   :  { %691 = vrcp.f32 %v554_v26  ;;  %v566_v30 = vand.u32 2147483648, %v554_v26  ;;  %v564_v32 = vand.u32 2147483647, %v554_v26  ;;  %vm560_vm4 = vweird.f32 %v554_v26 }
 0x289   :  { %v567_v34 = vor.u32 1.1754944e-38, %v566_v30  ;;  %vm565_vm6 = vcmp.eq.f32.partialorder %v564_v32, 8.507059e+37 }
 0x28d   :  { %v692_v27 = vpop.eup %691 }
 0x28e   :  { %v556_v28 = vmul.f32 %v692_v27, %v554_v26  ;;  %vm561_vm3 = vweird.f32 %v692_v27 }
 0x28f   :  { %vm562_vm5 = vmor %vm560_vm4, %vm561_vm3 }
 0x290   :  { %v557_v29 = vsub.f32 1.0, %v556_v28 }
 0x292   :  { %v558_v31 = vmul.f32 %v692_v27, %v557_v29 }
 0x294   :  { %v559_v33 = vadd.f32 %v692_v27, %v558_v31 }
 0x296   :  { %v563_v35 = vsel %vm562_vm5, %v692_v27, %v559_v33 }
 0x297   :  { %v568_v36 = vsel %vm565_vm6, %v567_v34, %v563_v35 }
 0x298   :  { %v569_v37 = vmul.f32 %v690_v19, %v568_v36 }
 0x29a   :  { %570 = vst.msk [vmem:[#allocation2] sm:$0x3] %vm537_vm2, %v569_v37 }
 0x29b   :  { %581 = dma.vmem_to_hbm [thread:$0]  %s577_s24, 32, %s579_s27, [#allocation3]  }
 0x29c   :  { %717 = dma.done.wait [#allocation3], 32  }
 0x29d   :  { %718 = vsyncadd [#allocation3], 4294967264 }
 0x29e   :  { %586 = vsyncpa [#allocation3], 1 }

</bundles_post_ra>
